<compile_context>
chip_gen: v6e
topology: v6e:2x2x1
jax: 0.10.0
libtpu: 0.0.40
codegen_flags: <defaults>
</compile_context>

<pallas_src>
import functools

import jax
import jax.numpy as jnp
from jax import lax
from jax.experimental import pallas as pl
from jax.experimental.pallas import tpu as pltpu


def _channel_attention_kernel(x_ref, w1t_ref, w2t_ref, o_ref,
                              sum_acc, max_acc,
                              *, L, L_tile, acc_lanes, n_chunks, num_l, has_tail):
    # x_ref   : (B_tile, C, L_tile) f32   current x tile
    # w1t_ref : (C, H) f32                fc1 weight, pre-transposed
    # w2t_ref : (H, C) f32                fc2 weight, pre-transposed
    # o_ref   : (B_tile, C) f32           resident across the L grid axis
    # sum_acc : (B_tile, C, acc_lanes) f32 VMEM scratch (running sum)
    # max_acc : (B_tile, C, acc_lanes) f32 VMEM scratch (running max)
    l_step = pl.program_id(1)

    @pl.when(l_step == 0)
    def _init():
        sum_acc[...] = jnp.zeros(sum_acc.shape, sum_acc.dtype)
        max_acc[...] = jnp.full(max_acc.shape, -jnp.inf, max_acc.dtype)

    def _accumulate(mask_tail):
        # Local (register) accumulation over the lane chunks of this tile, then
        # exactly ONE read-modify-write of each VMEM accumulator per grid step.
        b_rows, chans = x_ref.shape[0], x_ref.shape[1]
        tile_start = (num_l - 1) * L_tile
        lane = None
        if mask_tail:
            # Hoist a single lane iota out of the chunk loop (JAX does not CSE
            # broadcast_iota); it is only ever traced on the final l step.
            if any(0 < L - (tile_start + ci * acc_lanes) < acc_lanes
                   for ci in range(n_chunks)):
                lane = lax.broadcasted_iota(
                    jnp.int32, (b_rows, chans, acc_lanes), 2)

        local_sum = None
        local_max = None
        for ci in range(n_chunks):
            chunk = x_ref[:, :, ci * acc_lanes:(ci + 1) * acc_lanes]
            max_c = chunk
            if mask_tail:
                # Static per-chunk validity (all quantities are Python ints).
                valid = L - (tile_start + ci * acc_lanes)
                if valid <= 0:
                    continue  # chunk is entirely zero padding
                if valid < acc_lanes:
                    # Only the max branch needs masking; the wrapper zero-pads
                    # L, so padding is already neutral for the sum.
                    max_c = jnp.where(lane < valid, chunk, -jnp.inf)
            local_sum = chunk if local_sum is None else local_sum + chunk
            local_max = max_c if local_max is None else jnp.maximum(local_max, max_c)

        if local_sum is not None:
            sum_acc[...] = sum_acc[...] + local_sum
            max_acc[...] = jnp.maximum(max_acc[...], local_max)

    if has_tail:
        # Steady-state steps: pure load + add + max, no masking whatsoever.
        @pl.when(l_step < num_l - 1)
        def _steady():
            _accumulate(False)

        # Only the final step can touch padded lanes.
        @pl.when(l_step == num_l - 1)
        def _tail():
            _accumulate(True)
    else:
        _accumulate(False)

    @pl.when(l_step == num_l - 1)
    def _finalize():
        # One cross-lane reduce each (XLU), only in the epilogue.
        avg = jnp.sum(sum_acc[...], axis=-1) * (1.0 / L)       # (B_tile, C)
        mx = jnp.max(max_acc[...], axis=-1)                    # (B_tile, C)
        w1t = w1t_ref[...]                                      # (C, H)
        w2t = w2t_ref[...]                                      # (H, C)
        b_tile = avg.shape[0]
        if b_tile % 8 == 0:
            # Fused branches: one pass through fc1 -> ReLU -> fc2 for both pools.
            pooled = jnp.concatenate([avg, mx], axis=0)         # (2*B_tile, C)
            h = jnp.maximum(
                jnp.dot(pooled, w1t, preferred_element_type=jnp.float32), 0.0)
            y = jnp.dot(h, w2t, preferred_element_type=jnp.float32)
            out = y[:b_tile] + y[b_tile:]
        else:
            # Tiny / sublane-unaligned batch: two small matmul chains are safer
            # to lower than an unaligned sublane concat, and just as cheap here.
            ha = jnp.maximum(
                jnp.dot(avg, w1t, preferred_element_type=jnp.float32), 0.0)
            hm = jnp.maximum(
                jnp.dot(mx, w1t, preferred_element_type=jnp.float32), 0.0)
            out = (jnp.dot(ha, w2t, preferred_element_type=jnp.float32)
                   + jnp.dot(hm, w2t, preferred_element_type=jnp.float32))
        o_ref[...] = jax.nn.sigmoid(out)


def _vmem_capacity_bytes():
    """Physical VMEM of the local chip (128 MiB v5e/v6e, 64 MiB per-TC v7x)."""
    try:
        info = pltpu.get_tpu_info()
        cap = getattr(info, "vmem_capacity_bytes", None)
        if cap:
            return int(cap)
    except Exception:
        pass
    return 64 * 1024 * 1024   # conservative fallback works on every generation


def _pick_b_tile(B, C, usable_bytes):
    """Multiple-of-8 batch tile <= 32 giving >= 2 (preferably even #) b blocks."""
    if B % 8 != 0 or B < 16:
        return B                       # (8,128) rule: tile must be %8 or full B
    acc_cap = usable_bytes // 3        # accumulators must not eat the x budget
    cands = []
    for bt in range(8, min(B // 2, 32) + 1, 8):
        if B % bt:
            continue
        acc_bytes = 2 * bt * C * 128 * 4
        cands.append((acc_bytes <= acc_cap, (B // bt) % 2 == 0, bt))
    if not cands:
        return B
    fitting = [c for c in cands if c[0]]
    if fitting:
        return max(fitting, key=lambda c: (c[1], c[2]))[2]
    return min(c[2] for c in cands)


def channel_attention(x, w1, w2):
    """x: (B, C, L) f32; w1: (H, C) = fc1 weight; w2: (C, H) = fc2 weight.

    Returns (B, C, 1) f32, matching ChannelAttention.forward.
    """
    B, C, L = x.shape
    H = w1.shape[0]

    cap_bytes = _vmem_capacity_bytes()
    usable = (cap_bytes * 3) // 4          # ~96 MiB on v5e/v6e, ~48 MiB on v7x

    # ---- B tile: multiple of 8 (<=32) with >=2 blocks when possible ----------
    B_tile = _pick_b_tile(B, C, usable)
    num_b = B // B_tile

    # ---- VMEM accounting (drives L tile size and vmem_limit_bytes) ----------
    acc_bytes = 2 * B_tile * C * 128 * 4          # two (B_tile, C, 128) f32 accs
    w_bytes = 2 * 2 * C * H * 4                   # double-buffered weights
    out_bytes = 2 * B_tile * C * 4
    fixed_bytes = acc_bytes + w_bytes + out_bytes + (1 << 20)

    n_buf_budget = 3                              # budget for triple-buffered x
    per_buf_cap = (12 << 20) if cap_bytes >= (96 << 20) else (4 << 20)
    lane_bytes = B_tile * C * 4                   # bytes per L position of tile
    avail_x = max(usable - fixed_bytes, n_buf_budget * 128 * lane_bytes)
    per_buf = min(per_buf_cap, avail_x // n_buf_budget)
    max_lanes = max(128, (per_buf // lane_bytes) // 128 * 128)
    max_lanes = min(max_lanes, 128 * 128)         # cap unrolled chunk count

    # ---- L tile: lane-dense multiple of 128, minimal padded length ----------
    if L <= 128:
        L_tile, L_pad = L, L
    else:
        best = None
        for cand in range(128, max_lanes + 1, 128):
            pad = ((L + cand - 1) // cand) * cand
            if best is None or pad < best[1] or (pad == best[1] and cand > best[0]):
                best = (cand, pad)
        L_tile, L_pad = best
    num_l = L_pad // L_tile
    acc_lanes = min(L_tile, 128)
    n_chunks = L_tile // acc_lanes
    has_tail = L_pad != L

    if has_tail:
        x = jnp.pad(x, ((0, 0), (0, 0), (0, L_pad - L)))

    # Pre-transpose the static weights once, outside the kernel.
    w1t = jnp.transpose(w1)   # (C, H)
    w2t = jnp.transpose(w2)   # (H, C)

    x_tile_bytes = B_tile * C * L_tile * 4
    use_triple = num_l >= 3 and (3 * x_tile_bytes + fixed_bytes) <= usable
    n_buf = 3 if use_triple else 2
    total_live = n_buf * x_tile_bytes + fixed_bytes
    vmem_limit = int(min(cap_bytes - (4 << 20),
                         max(total_live + (8 << 20), 32 << 20)))

    kernel = functools.partial(
        _channel_attention_kernel,
        L=L, L_tile=L_tile, acc_lanes=acc_lanes, n_chunks=n_chunks,
        num_l=num_l, has_tail=has_tail)

    def _run(x_spec):
        return pl.pallas_call(
            kernel,
            out_shape=jax.ShapeDtypeStruct((B, C), jnp.float32),
            grid_spec=pltpu.PrefetchScalarGridSpec(
                num_scalar_prefetch=0,
                grid=(num_b, num_l),
                in_specs=[
                    x_spec,
                    pl.BlockSpec((C, H), lambda b, l: (0, 0)),
                    pl.BlockSpec((H, C), lambda b, l: (0, 0)),
                ],
                out_specs=pl.BlockSpec((B_tile, C), lambda b, l: (b, 0)),
                scratch_shapes=[
                    pltpu.VMEM((B_tile, C, acc_lanes), jnp.float32),  # running sum
                    pltpu.VMEM((B_tile, C, acc_lanes), jnp.float32),  # running max
                ],
            ),
            compiler_params=pltpu.CompilerParams(
                dimension_semantics=("parallel", "arbitrary"),
                vmem_limit_bytes=vmem_limit,
            ),
            cost_estimate=pl.CostEstimate(
                flops=2 * B * C * L_pad + 8 * B * C * H,
                transcendentals=B * C,
                bytes_accessed=4 * (B * C * L_pad + 2 * C * H + B * C),
            ),
        )(x, w1t, w2t)

    out = None
    if use_triple:
        # Deeper (3-buffer) input pipelining when the L grid is long enough and
        # VMEM permits; fall back gracefully if this Pallas build rejects it.
        try:
            x_spec3 = pl.BlockSpec((B_tile, C, L_tile), lambda b, l: (b, 0, l),
                                   pipeline_mode=pl.Buffered(3))
            out = jax.block_until_ready(_run(x_spec3))
        except Exception:
            out = None
    if out is None:
        out = _run(pl.BlockSpec((B_tile, C, L_tile), lambda b, l: (b, 0, l)))
    return out[:, :, None]


def reference(x, w1, w2):
    avg = jnp.mean(x, axis=-1)
    mx = jnp.max(x, axis=-1)
    a = jnp.maximum(avg @ w1.T, 0.0) @ w2.T
    m = jnp.maximum(mx @ w1.T, 0.0) @ w2.T
    return jax.nn.sigmoid(a + m)[:, :, None]


if __name__ == "__main__":
    ratio = 8

    # Small toy shapes consistent with the module (in_planes=32, ratio=8).
    B, C, L = 2, 32, 16
    H = C // ratio
    kx, k1, k2 = jax.random.split(jax.random.PRNGKey(0), 3)
    x = jax.random.normal(kx, (B, C, L), dtype=jnp.float32)
    w1 = jax.random.normal(k1, (H, C), dtype=jnp.float32) * (1.0 / C ** 0.5)
    w2 = jax.random.normal(k2, (C, H), dtype=jnp.float32) * (1.0 / H ** 0.5)
    out = jax.block_until_ready(channel_attention(x, w1, w2))
    ref = reference(x, w1, w2)
    assert out.shape == (B, C, 1)
    assert jnp.allclose(out, ref, atol=1e-5, rtol=1e-5)

    # Second (still small) shape that exercises B tiling (>=2 parallel blocks),
    # a multi-step L reduction with last-step tail masking, multi-chunk local
    # accumulation and the fused avg/max matmul epilogue branch.
    B2, C2, L2 = 16, 128, 1100
    H2 = C2 // ratio
    kx2, k12, k22 = jax.random.split(jax.random.PRNGKey(1), 3)
    x2 = jax.random.normal(kx2, (B2, C2, L2), dtype=jnp.float32)
    w12 = jax.random.normal(k12, (H2, C2), dtype=jnp.float32) * (1.0 / C2 ** 0.5)
    w22 = jax.random.normal(k22, (C2, H2), dtype=jnp.float32) * (1.0 / H2 ** 0.5)
    out2 = jax.block_until_ready(channel_attention(x2, w12, w22))
    ref2 = reference(x2, w12, w22)
    assert out2.shape == (B2, C2, 1)
    assert jnp.allclose(out2, ref2, atol=1e-5, rtol=1e-5)

    print("KERNEL_OK")
</pallas_src>

<mosaic_0001>
module attributes {stable_mosaic.version = 11 : i64} {
  func.func @_channel_attention_kernel(%arg0: i32, %arg1: i32, %arg2: memref<2x32x16xf32, #tpu.memory_space<vmem>>, %arg3: memref<32x4xf32, #tpu.memory_space<vmem>>, %arg4: memref<4x32xf32, #tpu.memory_space<vmem>>, %arg5: memref<2x32xf32, #tpu.memory_space<vmem>>, %arg6: memref<2x32x16xf32, #tpu.memory_space<vmem>>, %arg7: memref<2x32x16xf32, #tpu.memory_space<vmem>>) attributes {dimension_semantics = [#tpu.dimension_semantics<parallel>, #tpu.dimension_semantics<arbitrary>], iteration_bounds = array<i64: 1, 1>, scalar_prefetch = 0 : i64, scratch_operands = 2 : i64, tpu.core_type = #tpu.core_type<tc>, window_params = [{transform_indices = @transform_0, window_bounds = array<i64: 2, 32, 16>}, {pipeline_mode = #tpu.pipeline_mode<synchronous>, transform_indices = @transform_1, window_bounds = array<i64: 32, 4>}, {pipeline_mode = #tpu.pipeline_mode<synchronous>, transform_indices = @transform_2, window_bounds = array<i64: 4, 32>}, {transform_indices = @transform_3, window_bounds = array<i64: 2, 32>}]} {
    %c0_i32 = arith.constant 0 : i32
    %0 = arith.cmpi eq, %arg1, %c0_i32 : i32
    %1 = arith.extui %0 : i1 to i32
    %c0_i32_0 = arith.constant 0 : i32
    %2 = arith.cmpi ne, %1, %c0_i32_0 : i32
    scf.if %2 {
      %cst = arith.constant 0.000000e+00 : f32
      %13 = vector.broadcast %cst : f32 to vector<2x32x16xf32>
      %c0_17 = arith.constant 0 : index
      %c0_18 = arith.constant 0 : index
      %c0_19 = arith.constant 0 : index
      %14 = vector.load %arg6[%c0_17, %c0_18, %c0_19] : memref<2x32x16xf32, #tpu.memory_space<vmem>>, vector<2x32x16xf32>
      tpu.vector_store %arg6[%c0_17, %c0_18, %c0_19], %13 {strides = array<i32>} : memref<2x32x16xf32, #tpu.memory_space<vmem>>, vector<2x32x16xf32>,
      %cst_20 = arith.constant 0xFF800000 : f32
      %15 = vector.broadcast %cst_20 : f32 to vector<2x32x16xf32>
      %c0_21 = arith.constant 0 : index
      %c0_22 = arith.constant 0 : index
      %c0_23 = arith.constant 0 : index
      %16 = vector.load %arg7[%c0_21, %c0_22, %c0_23] : memref<2x32x16xf32, #tpu.memory_space<vmem>>, vector<2x32x16xf32>
      tpu.vector_store %arg7[%c0_21, %c0_22, %c0_23], %15 {strides = array<i32>} : memref<2x32x16xf32, #tpu.memory_space<vmem>>, vector<2x32x16xf32>,
    } else {
    }
    %c0 = arith.constant 0 : index
    %c0_1 = arith.constant 0 : index
    %c0_2 = arith.constant 0 : index
    %3 = vector.load %arg2[%c0, %c0_1, %c0_2] : memref<2x32x16xf32, #tpu.memory_space<vmem>>, vector<2x32x16xf32>
    %c0_3 = arith.constant 0 : index
    %c0_4 = arith.constant 0 : index
    %c0_5 = arith.constant 0 : index
    %4 = vector.load %arg6[%c0_3, %c0_4, %c0_5] : memref<2x32x16xf32, #tpu.memory_space<vmem>>, vector<2x32x16xf32>
    %5 = arith.addf %4, %3 : vector<2x32x16xf32>
    %c0_6 = arith.constant 0 : index
    %c0_7 = arith.constant 0 : index
    %c0_8 = arith.constant 0 : index
    %6 = vector.load %arg6[%c0_6, %c0_7, %c0_8] : memref<2x32x16xf32, #tpu.memory_space<vmem>>, vector<2x32x16xf32>
    tpu.vector_store %arg6[%c0_6, %c0_7, %c0_8], %5 {strides = array<i32>} : memref<2x32x16xf32, #tpu.memory_space<vmem>>, vector<2x32x16xf32>,
    %c0_9 = arith.constant 0 : index
    %c0_10 = arith.constant 0 : index
    %c0_11 = arith.constant 0 : index
    %7 = vector.load %arg7[%c0_9, %c0_10, %c0_11] : memref<2x32x16xf32, #tpu.memory_space<vmem>>, vector<2x32x16xf32>
    %8 = arith.maximumf %7, %3 : vector<2x32x16xf32>
    %c0_12 = arith.constant 0 : index
    %c0_13 = arith.constant 0 : index
    %c0_14 = arith.constant 0 : index
    %9 = vector.load %arg7[%c0_12, %c0_13, %c0_14] : memref<2x32x16xf32, #tpu.memory_space<vmem>>, vector<2x32x16xf32>
    tpu.vector_store %arg7[%c0_12, %c0_13, %c0_14], %8 {strides = array<i32>} : memref<2x32x16xf32, #tpu.memory_space<vmem>>, vector<2x32x16xf32>,
    %c0_i32_15 = arith.constant 0 : i32
    %10 = arith.cmpi eq, %arg1, %c0_i32_15 : i32
    %11 = arith.extui %10 : i1 to i32
    %c0_i32_16 = arith.constant 0 : i32
    %12 = arith.cmpi ne, %11, %c0_i32_16 : i32
    scf.if %12 {
      %c0_17 = arith.constant 0 : index
      %c0_18 = arith.constant 0 : index
      %c0_19 = arith.constant 0 : index
      %13 = vector.load %arg6[%c0_17, %c0_18, %c0_19] : memref<2x32x16xf32, #tpu.memory_space<vmem>>, vector<2x32x16xf32>
      %cst = arith.constant dense<0.000000e+00> : vector<2x32xf32>
      %14 = vector.multi_reduction <add>, %13, %cst [2] : vector<2x32x16xf32> to vector<2x32xf32>
      %cst_20 = arith.constant 6.250000e-02 : f32
      %15 = vector.broadcast %cst_20 : f32 to vector<2x32xf32>
      %16 = arith.mulf %14, %15 : vector<2x32xf32>
      %c0_21 = arith.constant 0 : index
      %c0_22 = arith.constant 0 : index
      %c0_23 = arith.constant 0 : index
      %17 = vector.load %arg7[%c0_21, %c0_22, %c0_23] : memref<2x32x16xf32, #tpu.memory_space<vmem>>, vector<2x32x16xf32>
      %cst_24 = arith.constant dense<0xFF800000> : vector<2x32xf32>
      %18 = vector.multi_reduction <maximumf>, %17, %cst_24 [2] : vector<2x32x16xf32> to vector<2x32xf32>
      %c0_25 = arith.constant 0 : index
      %c0_26 = arith.constant 0 : index
      %19 = vector.load %arg3[%c0_25, %c0_26] : memref<32x4xf32, #tpu.memory_space<vmem>>, vector<32x4xf32>
      %c0_27 = arith.constant 0 : index
      %c0_28 = arith.constant 0 : index
      %20 = vector.load %arg4[%c0_27, %c0_28] : memref<4x32xf32, #tpu.memory_space<vmem>>, vector<4x32xf32>
      %cst_29 = arith.constant dense<0.000000e+00> : vector<2x4xf32>
      %21 = tpu.matmul %16, %19, %cst_29 {dimension_numbers = #tpu.dot_dimension_numbers<[1], [0], [0], [1], [0, 0, 1, 1], [], []>} : vector<2x32xf32>, vector<32x4xf32>, vector<2x4xf32> -> vector<2x4xf32>
      %cst_30 = arith.constant 0.000000e+00 : f32
      %22 = vector.broadcast %cst_30 : f32 to vector<2x4xf32>
      %23 = arith.maximumf %21, %22 : vector<2x4xf32>
      %cst_31 = arith.constant dense<0.000000e+00> : vector<2x4xf32>
      %24 = tpu.matmul %18, %19, %cst_31 {dimension_numbers = #tpu.dot_dimension_numbers<[1], [0], [0], [1], [0, 0, 1, 1], [], []>} : vector<2x32xf32>, vector<32x4xf32>, vector<2x4xf32> -> vector<2x4xf32>
      %cst_32 = arith.constant 0.000000e+00 : f32
      %25 = vector.broadcast %cst_32 : f32 to vector<2x4xf32>
      %26 = arith.maximumf %24, %25 : vector<2x4xf32>
      %cst_33 = arith.constant dense<0.000000e+00> : vector<2x32xf32>
      %27 = tpu.matmul %23, %20, %cst_33 {dimension_numbers = #tpu.dot_dimension_numbers<[1], [0], [0], [1], [0, 0, 1, 1], [], []>} : vector<2x4xf32>, vector<4x32xf32>, vector<2x32xf32> -> vector<2x32xf32>
      %cst_34 = arith.constant dense<0.000000e+00> : vector<2x32xf32>
      %28 = tpu.matmul %26, %20, %cst_34 {dimension_numbers = #tpu.dot_dimension_numbers<[1], [0], [0], [1], [0, 0, 1, 1], [], []>} : vector<2x4xf32>, vector<4x32xf32>, vector<2x32xf32> -> vector<2x32xf32>
      %29 = arith.addf %27, %28 : vector<2x32xf32>
      %30 = arith.negf %29 : vector<2x32xf32>
      %31 = math.exp %30 : vector<2x32xf32>
      %cst_35 = arith.constant 1.000000e+00 : f32
      %32 = vector.broadcast %cst_35 : f32 to vector<2x32xf32>
      %33 = arith.addf %32, %31 : vector<2x32xf32>
      %34 = arith.divf %32, %33 : vector<2x32xf32>
      %c0_36 = arith.constant 0 : index
      %c0_37 = arith.constant 0 : index
      %35 = vector.load %arg5[%c0_36, %c0_37] : memref<2x32xf32, #tpu.memory_space<vmem>>, vector<2x32xf32>
      tpu.vector_store %arg5[%c0_36, %c0_37], %34 {strides = array<i32>} : memref<2x32xf32, #tpu.memory_space<vmem>>, vector<2x32xf32>,
    } else {
    }
    return
  }
  func.func @transform_0(%arg0: i32, %arg1: i32) -> (i32, i32, i32) {
    %c0_i32 = arith.constant 0 : i32
    %c0_i32_0 = arith.constant 0 : i32
    return %arg0, %c0_i32, %arg1 : i32, i32, i32
  }
  func.func @transform_1(%arg0: i32, %arg1: i32) -> (i32, i32) {
    %c0_i32 = arith.constant 0 : i32
    %c0_i32_0 = arith.constant 0 : i32
    %c0_i32_1 = arith.constant 0 : i32
    return %c0_i32, %c0_i32_0 : i32, i32
  }
  func.func @transform_2(%arg0: i32, %arg1: i32) -> (i32, i32) {
    %c0_i32 = arith.constant 0 : i32
    %c0_i32_0 = arith.constant 0 : i32
    %c0_i32_1 = arith.constant 0 : i32
    return %c0_i32, %c0_i32_0 : i32, i32
  }
  func.func @transform_3(%arg0: i32, %arg1: i32) -> (i32, i32) {
    %c0_i32 = arith.constant 0 : i32
    %c0_i32_0 = arith.constant 0 : i32
    return %arg0, %c0_i32 : i32, i32
  }
}

</mosaic_0001>

<bundles_post_ra>
// kernel: tpu_custom_call.1
= control target key start
LH: loop header
LB: loop body
LE: loop exit
PB: predicated region body
PF: predicated region fallthrough
CT: control target
= control target key end

     0   :  { %vm19_vm0 = vcmask 130048   ;;  %v679_v0 = vmov 0.0   ;;  %v680_v1 = vmov -inf   ;;  %s835_s0 = inlined_call_operand.vmem [shape: f32[2,32,16], index: 0, kind: input, shape index: {}]   ;;  %s836_s1 = inlined_call_operand.vmem [shape: f32[32,4], index: 1, kind: input, shape index: {}]   ;;  %s837_s2 = inlined_call_operand.vmem [shape: f32[4,32], index: 2, kind: input, shape index: {}]   ;;  %s838_s3 = inlined_call_operand.hbm [shape: f32[2,32], index: 3, kind: output, shape index: {}]  }
   0x1   :  { %24 = vst.msk [vmem:[#allocation2 + $0x20] sm:$0xff] %vm19_vm0, %v679_v0  ;;  %20 = vst.msk [vmem:[#allocation2] sm:$0xff] %vm19_vm0, %v679_v0  ;;  %617 = vmatprep.subr.mxu0 %v679_v0  ;;  %628 = vmatprep.subr.mxu1 %v679_v0 }
   0x2   :  { %21 = vst.msk [vmem:[#allocation2 + $0x8] sm:$0xff] %vm19_vm0, %v679_v0  ;;  %22 = vst.msk [vmem:[#allocation2 + $0x10] sm:$0xff] %vm19_vm0, %v679_v0 }
   0x3   :  { %23 = vst.msk [vmem:[#allocation2 + $0x18] sm:$0xff] %vm19_vm0, %v679_v0  ;;  %25 = vst.msk [vmem:[#allocation2 + $0x28] sm:$0xff] %vm19_vm0, %v679_v0 }
   0x4   :  { %26 = vst.msk [vmem:[#allocation2 + $0x30] sm:$0xff] %vm19_vm0, %v679_v0  ;;  %27 = vst.msk [vmem:[#allocation2 + $0x38] sm:$0xff] %vm19_vm0, %v679_v0 }
   0x5   :  { %29 = vst.msk [vmem:[#allocation3 + $0x8] sm:$0xff] %vm19_vm0, %v680_v1  ;;  %28 = vst.msk [vmem:[#allocation3] sm:$0xff] %vm19_vm0, %v680_v1 }
   0x6   :  { %30 = vst.msk [vmem:[#allocation3 + $0x10] sm:$0xff] %vm19_vm0, %v680_v1  ;;  %31 = vst.msk [vmem:[#allocation3 + $0x18] sm:$0xff] %vm19_vm0, %v680_v1 }
   0x7   :  { %32 = vst.msk [vmem:[#allocation3 + $0x20] sm:$0xff] %vm19_vm0, %v680_v1  ;;  %33 = vst.msk [vmem:[#allocation3 + $0x28] sm:$0xff] %vm19_vm0, %v680_v1 }
   0x8   :  { %34 = vst.msk [vmem:[#allocation3 + $0x30] sm:$0xff] %vm19_vm0, %v680_v1  ;;  %35 = vst.msk [vmem:[#allocation3 + $0x38] sm:$0xff] %vm19_vm0, %v680_v1 }
   0x9   :  { %8 = vsyncpa [#allocation5], 0  ;;  %v40_v2 = vld [vmem:[%s835_s0 + $0x20] sm:$0xff]  ;;  %v41_v4 = vld [vmem:[%s835_s0 + $0x28] sm:$0xff]  ;;  %vm681_vm1 = vmmov 0   ;;  %vm192_vm2 = vcmask 130112  }
   0xa   :  { %v36_v3 = vld [vmem:[%s835_s0] sm:$0xff]  ;;  %v37_v5 = vld [vmem:[%s835_s0 + $0x8] sm:$0xff]  ;;  %v42_v6 = vld [vmem:[%s835_s0 + $0x30] sm:$0xff]  ;;  %625 = vmatprep.mubr.msk.f32.mxu0 %vm681_vm1, %v679_v0  ;;  %636 = vmatprep.mubr.msk.f32.mxu1 %vm681_vm1, %v679_v0  ;;  %vm199_vm3 = vcmask 195712   ;;  %vm206_vm4 = vcmask 261312   ;;  %vm227_vm5 = vcmask 1041409  }
   0xb   :  { %v38_v7 = vld [vmem:[%s835_s0 + $0x10] sm:$0xff]  ;;  %v43_v8 = vld [vmem:[%s835_s0 + $0x38] sm:$0xff]  ;;  %v48_v10 = vld [vmem:[#allocation2 + $0x20] sm:$0xff]  ;;  %vm229_vm6 = vcmask 261120   ;;  %vm427_vm7 = vcmask 1043456   ;;  %vm423_vm8 = vcmask 31744  }
   0xc   :  { %v39_v9 = vld [vmem:[%s835_s0 + $0x18] sm:$0xff]  ;;  %v44_v11 = vld [vmem:[#allocation2] sm:$0xff]  ;;  %v49_v12 = vld [vmem:[#allocation2 + $0x28] sm:$0xff]  ;;  %v56_v13 = vadd.f32 %v48_v10, %v40_v2  ;;  %vm580_vm9 = vcmask 254976  }
   0xd   :  { %v52_v14 = vadd.f32 %v44_v11, %v36_v3  ;;  %v57_v15 = vadd.f32 %v49_v12, %v41_v4  ;;  %v45_v16 = vld [vmem:[#allocation2 + $0x8] sm:$0xff]  ;;  %v50_v17 = vld [vmem:[#allocation2 + $0x30] sm:$0xff]  ;;  %v51_v22 = vld [vmem:[#allocation2 + $0x38] sm:$0xff] }
   0xe   :  { %v46_v18 = vld [vmem:[#allocation2 + $0x10] sm:$0xff]  ;;  %v53_v19 = vadd.f32 %v45_v16, %v37_v5  ;;  %v58_v20 = vadd.f32 %v50_v17, %v42_v6  ;;  %v47_v23 = vld [vmem:[#allocation2 + $0x18] sm:$0xff]  ;;  %v70_v24 = vld [vmem:[#allocation3 + $0x8] sm:$0xff]  ;;  %65 = vst.msk [vmem:[#allocation2 + $0x20] sm:$0xff] %vm19_vm0, %v56_v13  ;;  %v59_v25 = vadd.f32 %v51_v22, %v43_v8 }
   0xf   :  { %v54_v21 = vadd.f32 %v46_v18, %v38_v7  ;;  %61 = vst.msk [vmem:[#allocation2] sm:$0xff] %vm19_vm0, %v52_v14  ;;  %66 = vst.msk [vmem:[#allocation2 + $0x28] sm:$0xff] %vm19_vm0, %v57_v15  ;;  %v55_v26 = vadd.f32 %v47_v23, %v39_v9  ;;  %v78_v27 = vmax.f32 %v70_v24, %v37_v5  ;;  %v69_v28 = vld [vmem:[#allocation3] sm:$0xff]  ;;  %v74_v29 = vld [vmem:[#allocation3 + $0x28] sm:$0xff]  ;;  %v181_v15 = vlaneseq }
  0x10   :  { %v73_v30 = vld [vmem:[#allocation3 + $0x20] sm:$0xff]  ;;  %62 = vst.msk [vmem:[#allocation2 + $0x8] sm:$0xff] %vm19_vm0, %v53_v19  ;;  %67 = vst.msk [vmem:[#allocation2 + $0x30] sm:$0xff] %vm19_vm0, %v58_v20  ;;  %v77_v31 = vmax.f32 %v69_v28, %v36_v3  ;;  %v82_v32 = vmax.f32 %v74_v29, %v41_v4  ;;  %v75_v34 = vld [vmem:[#allocation3 + $0x30] sm:$0xff] }
  0x11   :  { %63 = vst.msk [vmem:[#allocation2 + $0x10] sm:$0xff] %vm19_vm0, %v54_v21  ;;  %v81_v33 = vmax.f32 %v73_v30, %v40_v2  ;;  %v71_v35 = vld [vmem:[#allocation3 + $0x10] sm:$0xff]  ;;  %v76_v36 = vld [vmem:[#allocation3 + $0x38] sm:$0xff]  ;;  %68 = vst.msk [vmem:[#allocation2 + $0x38] sm:$0xff] %vm19_vm0, %v59_v25  ;;  %v83_v37 = vmax.f32 %v75_v34, %v42_v6  ;;  %v182_v18 = vand.u32 127, %v181_v15  ;;  %v184_v20 = vshrl.u32 %v181_v15, 7 }
  0x12   :  { %64 = vst.msk [vmem:[#allocation2 + $0x18] sm:$0xff] %vm19_vm0, %v55_v26  ;;  %86 = vst.msk [vmem:[#allocation3 + $0x8] sm:$0xff] %vm19_vm0, %v78_v27  ;;  %v79_v38 = vmax.f32 %v71_v35, %v38_v7  ;;  %v84_v39 = vmax.f32 %v76_v36, %v43_v8  ;;  %v72_v40 = vld [vmem:[#allocation3 + $0x18] sm:$0xff]  ;;  %v170_v10 = vld [vmem:[%s836_s1 + $0x10] sm:$0xff] }
  0x13   :  { %85 = vst.msk [vmem:[#allocation3] sm:$0xff] %vm19_vm0, %v77_v31  ;;  %90 = vst.msk [vmem:[#allocation3 + $0x28] sm:$0xff] %vm19_vm0, %v82_v32  ;;  %v80_v41 = vmax.f32 %v72_v40, %v39_v9  ;;  %v171_v5 = vld [vmem:[%s836_s1 + $0x18] sm:$0xff]  ;;  %v169_v11 = vld [vmem:[%s836_s1 + $0x8] sm:$0xff]  ;;  %v187_v19 = vadd.s32 4294967288, %v182_v18  ;;  %v194_v23 = vadd.s32 4294967280, %v182_v18  ;;  %v185_v28 = vsub.s32 %v182_v18, %v184_v20 }
  0x14   :  { %89 = vst.msk [vmem:[#allocation3 + $0x20] sm:$0xff] %vm19_vm0, %v81_v33  ;;  %91 = vst.msk [vmem:[#allocation3 + $0x30] sm:$0xff] %vm19_vm0, %v83_v37  ;;  %618 = vmatpush3.msra.mxu0 %v171_v5  ;;  %629 = vmatpush3.msra.mxu1 %v171_v5  ;;  %v168_v14 = vld [vmem:[%s836_s1] sm:$0xff]  ;;  %v201_v27 = vadd.s32 4294967272, %v182_v18 }
  0x15   :  { %87 = vst.msk [vmem:[#allocation3 + $0x10] sm:$0xff] %vm19_vm0, %v79_v38  ;;  %92 = vst.msk [vmem:[#allocation3 + $0x38] sm:$0xff] %vm19_vm0, %v84_v39  ;;  %v100_v42 = vld [vmem:[#allocation2 + $0x20] sm:$0xff]  ;;  %619 = vmatprep.subr.mxu0 %v679_v0  ;;  %630 = vmatprep.subr.mxu1 %v679_v0  ;;  %v190_v24 = vsub.s32 %v187_v19, %v184_v20  ;;  %v197_v29 = vsub.s32 %v194_v23, %v184_v20 }
  0x16   :  { %88 = vst.msk [vmem:[#allocation3 + $0x18] sm:$0xff] %vm19_vm0, %v80_v41  ;;  %v96_v43 = vld [vmem:[#allocation2] sm:$0xff]  ;;  %v101_v44 = vld [vmem:[#allocation2 + $0x28] sm:$0xff]  ;;  %v116_v45 = vsel %vm19_vm0, %v100_v42, 0.0  ;;  %620 = vmatpush3.msra.mxu0 %v170_v10  ;;  %631 = vmatpush3.msra.mxu1 %v170_v10  ;;  %v204_v38 = vsub.s32 %v201_v27, %v184_v20 }
  0x17   :  { %v104_v46 = vsel %vm19_vm0, %v96_v43, 0.0  ;;  %v97_v47 = vld [vmem:[#allocation2 + $0x8] sm:$0xff]  ;;  %117 = vadd.xlane.f32.xlu1 %v116_v45  ;;  %v119_v48 = vsel %vm19_vm0, %v101_v44, 0.0  ;;  %v102_v50 = vld [vmem:[#allocation2 + $0x30] sm:$0xff]  ;;  %621 = vmatprep.subr.mxu0 %v679_v0 }
  0x18   :  { %105 = vadd.xlane.f32.xlu0 %v104_v46  ;;  %v107_v49 = vsel %vm19_vm0, %v97_v47, 0.0  ;;  %v98_v51 = vld [vmem:[#allocation2 + $0x10] sm:$0xff]  ;;  %v122_v52 = vsel %vm19_vm0, %v102_v50, 0.0  ;;  %v103_v54 = vld [vmem:[#allocation2 + $0x38] sm:$0xff]  ;;  %632 = vmatprep.subr.mxu1 %v679_v0 }
  0x19   :  { %v110_v53 = vsel %vm19_vm0, %v98_v51, 0.0  ;;  %v99_v55 = vld [vmem:[#allocation2 + $0x18] sm:$0xff]  ;;  %v125_v56 = vsel %vm19_vm0, %v103_v54, 0.0  ;;  %v137_v58 = vld [vmem:[#allocation3 + $0x8] sm:$0xff]  ;;  %622 = vmatpush3.msra.mxu0 %v169_v11  ;;  %633 = vmatpush3.msra.mxu1 %v169_v11 }
  0x1a   :  { %v113_v57 = vsel %vm19_vm0, %v99_v55, 0.0  ;;  %v136_v59 = vld [vmem:[#allocation3] sm:$0xff]  ;;  %v147_v60 = vsel %vm19_vm0, %v137_v58, -inf  ;;  %v141_v62 = vld [vmem:[#allocation3 + $0x28] sm:$0xff]  ;;  %623 = vmatprep.subr.mxu0 %v679_v0  ;;  %634 = vmatprep.subr.mxu1 %v679_v0 }
  0x1b   :  { %120 = vadd.xlane.f32.xlu1 %v119_v48  ;;  %v144_v61 = vsel %vm19_vm0, %v136_v59, -inf  ;;  %v140_v63 = vld [vmem:[#allocation3 + $0x20] sm:$0xff]  ;;  %v159_v1 = vsel %vm19_vm0, %v141_v62, -inf  ;;  %v142_v3 = vld [vmem:[#allocation3 + $0x30] sm:$0xff]  ;;  %624 = vmatpush3.msra.mxu0 %v168_v14 }
  0x1c   :  { %108 = vadd.xlane.f32.xlu0 %v107_v49  ;;  %v156_v2 = vsel %vm19_vm0, %v140_v63, -inf  ;;  %v138_v4 = vld [vmem:[#allocation3 + $0x10] sm:$0xff]  ;;  %v162_v6 = vsel %vm19_vm0, %v142_v3, -inf  ;;  %v143_v8 = vld [vmem:[#allocation3 + $0x38] sm:$0xff]  ;;  %635 = vmatpush3.msra.mxu1 %v168_v14 }
  0x1d   :  { %v150_v7 = vsel %vm19_vm0, %v138_v4, -inf  ;;  %v139_v9 = vld [vmem:[#allocation3 + $0x18] sm:$0xff]  ;;  %v165_v12 = vsel %vm19_vm0, %v143_v8, -inf  ;;  %644 = vmatprep.subr.mxu1 %v679_v0  ;;  %639 = vmatprep.subr.mxu0 %v679_v0 }
  0x1e   :  { %v153_v13 = vsel %vm19_vm0, %v139_v9, -inf }
  0x1f   :  { %123 = vadd.xlane.f32.xlu1 %v122_v52 }
  0x20   :  { %111 = vadd.xlane.f32.xlu0 %v110_v53 }
  0x23   :  { %126 = vadd.xlane.f32.xlu1 %v125_v56 }
  0x24   :  { %114 = vadd.xlane.f32.xlu0 %v113_v57 }
  0x27   :  { %148 = vmax.xlane.f32.xlu1 %v147_v60 }
  0x28   :  { %145 = vmax.xlane.f32.xlu0 %v144_v61 }
  0x2b   :  { %160 = vmax.xlane.f32.xlu1 %v159_v1 }
  0x2c   :  { %157 = vmax.xlane.f32.xlu0 %v156_v2 }
  0x2f   :  { %163 = vmax.xlane.f32.xlu1 %v162_v6 }
  0x30   :  { %151 = vmax.xlane.f32.xlu0 %v150_v7 }
  0x33   :  { %166 = vmax.xlane.f32.xlu1 %v165_v12 }
  0x34   :  { %154 = vmax.xlane.f32.xlu0 %v153_v13 }
  0xa0   :  { %v118_v16 = vpop.xlane.xlu1 %117 }
  0xa1   :  { %v106_v17 = vpop.xlane.xlu0 %105  ;;  %v132_v32 = vmul.f32 0.0625, %v118_v16  ;;  %v172_v16 = vld [vmem:[%s837_s2] sm:$0xf]  ;;  %s682_s2 = smov [#allocation4]  }
  0xa2   :  { %v128_v33 = vmul.f32 0.0625, %v106_v17  ;;  %s588_s9 = sshll.u32 %s682_s2, 4  ;;  %s589_s9 = int_to_ptr.vmem [resolvable:$true] %s588_s9 }
  0xa3   :  { %v211_v43 = vrot.slane %v132_v32, %v185_v28  ;;  %s657_s10 = scalar_lea.vmem %s589_s9, 32  ;;  %p662_p1 = scmp.lt.s32.totalorder %s589_s9, %s589_s9 }
  0xa4   :  { %v121_v21 = vpop.xlane.xlu1 %120  ;;  %v186_v44 = vrot.slane %v128_v33, %v185_v28  ;;  %p658_p0 = scmp.ne.s32.totalorder %s589_s9, %s657_s10  ;;  %p663_p2 = scmp.lt.s32.totalorder %s657_s10, %s657_s10 }
  0xa5   :  { %v109_v22 = vpop.xlane.xlu0 %108  ;;  %v133_v25 = vmul.f32 0.0625, %v121_v21 }
  0xa6   :  { %v129_v26 = vmul.f32 0.0625, %v109_v22  ;;  %p664_p3 = por %p663_p2, %p662_p1 }
  0xa7   :  { %v215_v36 = vrot.slane %v133_v25, %v190_v24 }
  0xa8   :  { %v124_v30 = vpop.xlane.xlu1 %123  ;;  %v191_v37 = vrot.slane %v129_v26, %v190_v24  ;;  %p665_p4 = pnand %p664_p3, %p658_p0 }
  0xa9   :  { %v112_v31 = vpop.xlane.xlu0 %111  ;;  %v134_v34 = vmul.f32 0.0625, %v124_v30  ;;  %v216_v47 = vsel %vm192_vm2, %v215_v36, %v211_v43 }
  0xaa   :  { %v130_v35 = vmul.f32 0.0625, %v112_v31  ;;  %v193_v48 = vsel %vm192_vm2, %v191_v37, %v186_v44 }
  0xab   :  { %v220_v39 = vrot.slane %v134_v34, %v197_v29 }
  0xac   :  { %v198_v40 = vrot.slane %v130_v35, %v197_v29  ;;  %v127_v41 = vpop.xlane.xlu1 %126 }
  0xad   :  { %v115_v42 = vpop.xlane.xlu0 %114  ;;  %v135_v45 = vmul.f32 0.0625, %v127_v41  ;;  %v221_v51 = vsel %vm199_vm3, %v220_v39, %v216_v47 }
  0xae   :  { %v131_v46 = vmul.f32 0.0625, %v115_v42  ;;  %v200_v52 = vsel %vm199_vm3, %v198_v40, %v193_v48 }
  0xaf   :  { %v225_v49 = vrot.slane %v135_v45, %v204_v38 }
  0xb0   :  { %v205_v50 = vrot.slane %v131_v46, %v204_v38  ;;  %v149_v53 = vpop.xlane.xlu1 %148 }
  0xb1   :  { %v146_v54 = vpop.xlane.xlu0 %145  ;;  %v226_v56 = vsel %vm206_vm4, %v225_v49, %v221_v51  ;;  %v318_v62 = vrot.slane %v149_v53, %v190_v24 }
  0xb2   :  { %v207_v55 = vsel %vm206_vm4, %v205_v50, %v200_v52  ;;  %v314_v63 = vrot.slane %v146_v54, %v185_v28 }
  0xb3   :  { %v228_v57 = vsel %vm227_vm5, %v226_v56, %v207_v55 }
  0xb4   :  { %626 = vmatmul.mubr.msk.f32.vlgmr.msra.gmra.mxu0 %vm229_vm6, %v228_v57  ;;  %v161_v58 = vpop.xlane.xlu1 %160  ;;  %v319_v7 = vsel %vm192_vm2, %v318_v62, %v314_v63 }
  0xb5   :  { %v158_v59 = vpop.xlane.xlu0 %157  ;;  %641 = vmatprep.mubr.msk.f32.mxu0 %vm681_vm1, %v679_v0  ;;  %v337_v1 = vrot.slane %v161_v58, %v190_v24  ;;  %640 = vmatpush3.msk.msra.mxu0 %vm427_vm7, %v172_v16 }
  0xb6   :  { %v333_v2 = vrot.slane %v158_v59, %v185_v28 }
  0xb8   :  { %v164_v60 = vpop.xlane.xlu1 %163  ;;  %v338_v8 = vsel %vm192_vm2, %v337_v1, %v333_v2 }
  0xb9   :  { %v152_v61 = vpop.xlane.xlu0 %151  ;;  %v342_v3 = vrot.slane %v164_v60, %v197_v29 }
  0xba   :  { %v323_v4 = vrot.slane %v152_v61, %v197_v29 }
  0xbb   :  { %v343_v11 = vsel %vm199_vm3, %v342_v3, %v338_v8 }
  0xbc   :  { %v167_v5 = vpop.xlane.xlu1 %166  ;;  %v324_v12 = vsel %vm199_vm3, %v323_v4, %v319_v7 }
  0xbd   :  { %v155_v6 = vpop.xlane.xlu0 %154  ;;  %v347_v9 = vrot.slane %v167_v5, %v204_v38 }
  0xbe   :  { %v328_v10 = vrot.slane %v155_v6, %v204_v38 }
  0xbf   :  { %v348_v13 = vsel %vm206_vm4, %v347_v9, %v343_v11 }
  0xc0   :  { %v329_v14 = vsel %vm206_vm4, %v328_v10, %v324_v12 }
  0xc1   :  { %v349_v15 = vsel %vm227_vm5, %v348_v13, %v329_v14 }
  0xc2   :  { %637 = vmatmul.mubr.msk.f32.vlgmr.msra.gmra.mxu1 %vm229_vm6, %v349_v15 }
  0xc3   :  { %646 = vmatprep.mubr.msk.f32.mxu1 %vm681_vm1, %v679_v0  ;;  %645 = vmatpush3.msk.msra.mxu1 %vm427_vm7, %v172_v16 }
 0x174   :  { %v298_v17 = vpop.f32.mrf.mxu0 }
 0x175   :  { %v302_v18 = vmax.f32 %v298_v17, 0.0 }
 0x176   :  { %v627_v19 = vpop.f32.mrf.mxu0 }
 0x177   :  { %647 = vmatmul.mubr.msk.f32.vlgmr.msra.gmra.mxu1 %vm423_vm8, %v302_v18 }
 0x182   :  { %v418_v20 = vpop.f32.mrf.mxu1 }
 0x183   :  { %v422_v21 = vmax.f32 %v418_v20, 0.0 }
 0x184   :  { %v638_v22 = vpop.f32.mrf.mxu1 }
 0x185   :  { %642 = vmatmul.mubr.msk.f32.vlgmr.msra.gmra.mxu0 %vm423_vm8, %v422_v21 }
 0x237   :  { %v570_v23 = vpop.f32.mrf.mxu1 }
 0x239   :  { %v648_v24 = vpop.f32.mrf.mxu1 }
 0x245   :  { %v497_v25 = vpop.f32.mrf.mxu0 }
 0x246   :  { %v571_v0 = vadd.f32 %v570_v23, %v497_v25 }
 0x247   :  { %v643_v26 = vpop.f32.mrf.mxu0 }
 0x248   :  { %v602_v27 = vmul.f32 -1.442695, %v571_v0 }
 0x24a   :  { %653 = vpow2.f32 %v602_v27 }
 0x257   :  { %v654_v28 = vpop.eup %653 }
 0x258   :  { %v577_v29 = vadd.f32 1.0, %v654_v28 }
 0x25a   :  { %655 = vrcp.f32 %v577_v29 }
 0x267   :  { %v656_v30 = vpop.eup %655 }
 0x268   :  { %581 = vst.msk [vmem:[#allocation4] sm:$0x3] %vm580_vm9, %v656_v30 }
 0x269   :  { %668 = shalt.err (!%p665_p4)
}
 0x26a   :  { %591 = dma.vmem_to_hbm [thread:$0]  %s589_s9, 32, %s838_s3, [#allocation5]  }
 0x26b   :  { %677 = dma.done.wait [#allocation5], 32  }
 0x26c   :  { %678 = vsyncadd [#allocation5], 4294967264 }
 0x26d   :  { %595 = vsyncpa [#allocation5], 1 }

</bundles_post_ra>
